<compile_context>
chip_gen: v7x
topology: tpu7x:2x2x1
jax: 0.10.0
libtpu: 0.0.40
codegen_flags: <defaults>
</compile_context>

<pallas_src>
import jax
import jax.numpy as jnp
from jax.experimental import pallas as pl
from jax.experimental.pallas import tpu as pltpu

LANE = 128
SUBLANE = 8


def _round_up(x, m):
    return (x + m - 1) // m * m


def _pad2d(a, rows, cols):
    return jnp.pad(a, ((0, rows - a.shape[0]), (0, cols - a.shape[1])))


# ----------------------------------------------------------------------------
# Fused forward
# ----------------------------------------------------------------------------
def gnn_forward(adj_hat, x, w1, b1, w2, b2, pool, wl_t, bl, *, tm=128):
    """Fused GNN forward. Returns logits [num_graphs, num_classes] in f32.

    Requires `adj_hat` symmetric (undirected edge_index), which is what GCN's
    D^-1/2 (A+I) D^-1/2 normalization yields for undirected graphs — the kernel
    reconstructs (P @ A_hat)[:, tile] from the adjacency row tile via symmetry.
    On v6e/v7x, tm=256 is preferred when N allows (256-wide MXU).
    """
    n, f = x.shape
    h = w1.shape[1]
    g = pool.shape[0]
    c = wl_t.shape[1]

    hp = _round_up(h, LANE)   # hidden padded to lane width
    cp = _round_up(c, LANE)   # classes padded to lane width
    gp = _round_up(g, LANE)   # graphs padded to lane width: keeps the in-kernel
                              # (tm, gp) -> (gp, tm) transpose layout-friendly and
                              # costs no extra VMEM vs sublane padding.

    assert n % tm == 0, "pad num_nodes to a multiple of the row tile"
    n_tiles = n // tm
    # Split the row-tile reduction across 2 TensorCores when possible (v7x).
    splits = 2 if n_tiles % 2 == 0 else 1
    tiles_per = n_tiles // splits

    bf = jnp.bfloat16

    # ---- wrapper-side preprocessing (cheap: O(N*F*H) + O(N*G)) --------------
    xw1 = jnp.dot(x, w1, preferred_element_type=jnp.float32)          # (n, h) f32
    rhs = jnp.concatenate(
        [_pad2d(xw1, n, hp), _pad2d(pool.T, n, gp)], axis=1).astype(bf)  # (n, hp+gp)

    b1_p = _pad2d(b1, 1, hp)
    w2_b = _pad2d(w2, hp, hp).astype(bf)
    b2_p = _pad2d(b2, 1, hp)
    wl_b = _pad2d(wl_t, hp, cp).astype(bf)
    bl_p = _pad2d(bl, 1, cp)
    adj_b = adj_hat.astype(bf)
    # TODO(synk): on v7x the adjacency could be stored/DMA'd as fp8 (e4m3) to
    # halve the dominant HBM term; needs an accuracy check against the ref.

    # ---- VMEM budget for the row-tile kernel ---------------------------------
    vmem_need = (2 * tm * n * 2             # adjacency row-tile double buffer (bf16)
                 + n * (hp + gp) * 2        # resident [X@W1 | P^T] scratch (bf16, 1 copy)
                 + gp * hp * 4              # pooled_h accumulator (f32)
                 + 2 * gp * hp * 4          # partial-output buffers (f32)
                 + 8 * tm * (hp + gp) * 4   # f32 per-tile intermediates headroom
                 + (1 << 20))               # slack
    vmem_limit = int(min(max(vmem_need, 32 << 20), 64 << 20))

    # ---- kernel 1: adjacency row-tile loop -----------------------------------
    def tile_kernel(adj_ref, rhs_hbm, b1_ref, part_ref, rhs_vmem, acc_ref, dma_sem):
        t = pl.program_id(1)

        @pl.when(t == 0)
        def _init():
            # Load the resident RHS once per core (single-buffered scratch).
            copy_rhs = pltpu.make_async_copy(rhs_hbm, rhs_vmem, dma_sem)
            copy_rhs.start()
            copy_rhs.wait()
            acc_ref[...] = jnp.zeros_like(acc_ref)

        # One lane-dense MXU pass per tile:
        #   z[:, :hp] = A_hat[tile, :] @ (X W1)
        #   z[:, hp:] = A_hat[tile, :] @ P^T  ( = (P @ A_hat)[:, tile]^T, A symmetric )
        z = jnp.dot(adj_ref[...], rhs_vmem[...],
                    preferred_element_type=jnp.float32)                # (tm, hp+gp)
        h_t = jnp.maximum(z[:, :hp] + b1_ref[...], 0.0)                # conv1 + ReLU
        pa_t = z[:, hp:]                                               # (tm, gp)

        # pooled_h += (P @ A_hat)[:, tile] @ h_tile   (W2 applied once, in finalize)
        acc_ref[...] += jnp.dot(pa_t.T.astype(jnp.bfloat16),
                                h_t.astype(jnp.bfloat16),
                                preferred_element_type=jnp.float32)

        @pl.when(t == pl.num_programs(1) - 1)
        def _flush():
            part_ref[...] = acc_ref[...]

    partials = pl.pallas_call(
        tile_kernel,
        out_shape=jax.ShapeDtypeStruct((splits, gp, hp), jnp.float32),
        grid=(splits, tiles_per),
        in_specs=[
            pl.BlockSpec((tm, n), lambda s, t: (s * tiles_per + t, 0)),  # A_hat rows
            pl.BlockSpec(memory_space=pl.ANY),                           # [X@W1 | P^T]
            pl.BlockSpec((1, hp), lambda s, t: (0, 0)),                  # b1
        ],
        out_specs=pl.BlockSpec((None, gp, hp), lambda s, t: (s, 0, 0)),
        scratch_shapes=[
            pltpu.VMEM((n, hp + gp), jnp.bfloat16),   # resident RHS (single copy)
            pltpu.VMEM((gp, hp), jnp.float32),        # pooled_h accumulator
            pltpu.SemaphoreType.DMA,
        ],
        compiler_params=pltpu.CompilerParams(
            dimension_semantics=("parallel", "arbitrary"),
            vmem_limit_bytes=vmem_limit,
        ),
    )(adj_b, rhs, b1_p)

    # ---- kernel 2: finalize (combine cores, W2 + b2, dropout(eval), Linear) --
    def finalize_kernel(part_ref, w2_ref, b2_ref, wl_ref, bl_ref, out_ref):
        pooled_h = part_ref[0]
        for s_ in range(1, splits):
            pooled_h = pooled_h + part_ref[s_]
        # Rows of P sum to 1, so adding b2 after the pool fold is exact.
        pooled = jnp.dot(pooled_h.astype(jnp.bfloat16), w2_ref[...],
                         preferred_element_type=jnp.float32) + b2_ref[...]
        # TODO(synk): nn.Dropout(p=0.5) is eval-mode identity; training mode
        # would need pltpu.prng_seed / pltpu.prng_random_bits masking here.
        out_ref[...] = jnp.dot(pooled.astype(jnp.bfloat16), wl_ref[...],
                               preferred_element_type=jnp.float32) + bl_ref[...]

    out = pl.pallas_call(
        finalize_kernel,
        out_shape=jax.ShapeDtypeStruct((gp, cp), jnp.float32),
    )(partials, w2_b, b2_p, wl_b, bl_p)
    return out[:g, :c]


# ----------------------------------------------------------------------------
# Plain-JAX glue: normalized adjacency and mean-pool matrix
# ----------------------------------------------------------------------------
def build_normalized_adjacency(edge_index, num_nodes):
    """A_hat = D^{-1/2} (A + I) D^{-1/2}; symmetric for undirected edge_index."""
    src, dst = edge_index[0], edge_index[1]
    a = jnp.zeros((num_nodes, num_nodes), jnp.float32).at[dst, src].add(1.0)
    a = a + jnp.eye(num_nodes, dtype=jnp.float32)
    deg = a.sum(axis=1)
    d_inv_sqrt = 1.0 / jnp.sqrt(jnp.maximum(deg, 1.0))
    return a * d_inv_sqrt[:, None] * d_inv_sqrt[None, :]


def build_mean_pool_matrix(batch, num_graphs, num_nodes):
    """P[g, n] = 1/|{n': batch[n']==g}| if batch[n]==g else 0 (rows sum to 1)."""
    onehot = (batch[None, :] == jnp.arange(num_graphs)[:, None]).astype(jnp.float32)
    counts = jnp.maximum(onehot.sum(axis=1, keepdims=True), 1.0)
    return onehot / counts


# ----------------------------------------------------------------------------
# Main
# ----------------------------------------------------------------------------
if __name__ == "__main__":
    num_nodes = 256          # N (multiple of the 128-row tile)
    num_node_features = 4    # F
    hidden_channels = 32     # H (padded to 128 inside the wrapper)
    num_classes = 3          # C (padded to 128 inside the wrapper)
    num_graphs = 2           # G
    nodes_per_graph = num_nodes // num_graphs

    key = jax.random.PRNGKey(0)
    k_x, k_w1, k_b1, k_w2, k_b2, k_wl, k_bl = jax.random.split(key, 7)

    # Node features.
    x = jax.random.normal(k_x, (num_nodes, num_node_features), jnp.float32)

    # Two ring graphs (bidirectional => symmetric adjacency), edge_index [2, E].
    edges = []
    for gi in range(num_graphs):
        base = gi * nodes_per_graph
        for i in range(nodes_per_graph):
            a, b = base + i, base + (i + 1) % nodes_per_graph
            edges.append((a, b))
            edges.append((b, a))
    edge_index = jnp.array(edges, dtype=jnp.int32).T

    # Node -> graph assignment.
    batch = jnp.repeat(jnp.arange(num_graphs, dtype=jnp.int32), nodes_per_graph)

    # Deterministic parameter init (shapes follow the PyTorch module).
    w1 = jax.random.normal(k_w1, (num_node_features, hidden_channels),
                           jnp.float32) * 0.1
    b1 = jax.random.normal(k_b1, (1, hidden_channels), jnp.float32) * 0.1
    w2 = jax.random.normal(k_w2, (hidden_channels, hidden_channels),
                           jnp.float32) * 0.1
    b2 = jax.random.normal(k_b2, (1, hidden_channels), jnp.float32) * 0.1
    # nn.Linear weight is (C, H); pass transposed (H, C) so kernels use x @ W.
    wl_t = (jax.random.normal(k_wl, (num_classes, hidden_channels),
                              jnp.float32) * 0.1).T
    bl = jax.random.normal(k_bl, (1, num_classes), jnp.float32) * 0.1

    adj_hat = build_normalized_adjacency(edge_index, num_nodes)   # [N, N], symmetric
    pool = build_mean_pool_matrix(batch, num_graphs, num_nodes)   # [G, N]

    out = gnn_forward(adj_hat, x, w1, b1, w2, b2, pool, wl_t, bl)
    jax.block_until_ready(out)

    # Pure-JAX reference mirroring the kernel's bf16 quantization points
    # (all accumulation in f32).
    def q(a):
        return a.astype(jnp.bfloat16).astype(jnp.float32)

    def dot(a, b):
        return jnp.dot(a, b, preferred_element_type=jnp.float32)

    xw1_r = q(dot(x, w1))                                   # hoisted X @ W1, then bf16
    h_r = jnp.maximum(dot(q(adj_hat), xw1_r) + b1, 0.0)     # conv1 + ReLU
    pa_r = dot(q(adj_hat), q(pool.T))                       # A_hat @ P^T  (= (P A_hat)^T)
    pooled_h_r = dot(q(pa_r.T), q(h_r))                     # P @ A_hat @ h
    pooled_r = dot(q(pooled_h_r), q(w2)) + b2               # conv2 folded with mean-pool
    ref = dot(q(pooled_r), q(wl_t)) + bl                    # dropout(eval)=id, Linear

    assert out.shape == (num_graphs, num_classes)
    assert jnp.allclose(out, ref, atol=2e-3, rtol=2e-2), \
        float(jnp.max(jnp.abs(out - ref)))

    print("KERNEL_OK")
</pallas_src>

<mosaic_0001>
module attributes {stable_mosaic.version = 11 : i64} {
  func.func @tile_kernel(%arg0: i32, %arg1: i32, %arg2: memref<128x256xbf16, #tpu.memory_space<vmem>>, %arg3: memref<256x256xbf16, #tpu.memory_space<any>>, %arg4: memref<1x128xf32, #tpu.memory_space<vmem>>, %arg5: memref<1x128x128xf32, #tpu.memory_space<vmem>>, %arg6: memref<256x256xbf16, #tpu.memory_space<vmem>>, %arg7: memref<128x128xf32, #tpu.memory_space<vmem>>, %arg8: memref<!tpu.dma_semaphore, #tpu.memory_space<semaphore_mem>>) attributes {dimension_semantics = [#tpu.dimension_semantics<parallel>, #tpu.dimension_semantics<arbitrary>], iteration_bounds = array<i64: 2, 1>, scalar_prefetch = 0 : i64, scratch_operands = 3 : i64, tpu.core_type = #tpu.core_type<tc>, window_params = [{transform_indices = @transform_0, window_bounds = array<i64: 128, 256>}, {}, {pipeline_mode = #tpu.pipeline_mode<synchronous>, transform_indices = @transform_2, window_bounds = array<i64: 1, 128>}, {transform_indices = @transform_3, window_bounds = array<i64: 1, 128, 128>}]} {
    %c0_i32 = arith.constant 0 : i32
    %0 = arith.cmpi eq, %arg1, %c0_i32 : i32
    %1 = arith.extui %0 : i1 to i32
    %c0_i32_0 = arith.constant 0 : i32
    %2 = arith.cmpi ne, %1, %c0_i32_0 : i32
    scf.if %2 {
      tpu.enqueue_dma source(%arg3 : memref<256x256xbf16, #tpu.memory_space<any>>) target(%arg6 : memref<256x256xbf16, #tpu.memory_space<vmem>>) target_semaphore(%arg8 : memref<!tpu.dma_semaphore, #tpu.memory_space<semaphore_mem>>)
      tpu.wait_dma2 semaphore(%arg8 : memref<!tpu.dma_semaphore, #tpu.memory_space<semaphore_mem>>) src(%arg3 : memref<256x256xbf16, #tpu.memory_space<any>>) dst(%arg6 : memref<256x256xbf16, #tpu.memory_space<vmem>>)
      %cst_14 = arith.constant 0.000000e+00 : f32
      %23 = vector.broadcast %cst_14 : f32 to vector<128x128xf32>
      %c0_15 = arith.constant 0 : index
      %c0_16 = arith.constant 0 : index
      %24 = vector.load %arg7[%c0_15, %c0_16] : memref<128x128xf32, #tpu.memory_space<vmem>>, vector<128x128xf32>
      tpu.vector_store %arg7[%c0_15, %c0_16], %23 {strides = array<i32>} : memref<128x128xf32, #tpu.memory_space<vmem>>, vector<128x128xf32>,
    } else {
    }
    %c0 = arith.constant 0 : index
    %c0_1 = arith.constant 0 : index
    %3 = vector.load %arg2[%c0, %c0_1] : memref<128x256xbf16, #tpu.memory_space<vmem>>, vector<128x256xbf16>
    %c0_2 = arith.constant 0 : index
    %c0_3 = arith.constant 0 : index
    %4 = vector.load %arg6[%c0_2, %c0_3] : memref<256x256xbf16, #tpu.memory_space<vmem>>, vector<256x256xbf16>
    %cst = arith.constant dense<0.000000e+00> : vector<128x256xf32>
    %5 = tpu.matmul %3, %4, %cst {dimension_numbers = #tpu.dot_dimension_numbers<[1], [0], [0], [1], [0, 0, 1, 1], [], []>} : vector<128x256xbf16>, vector<256x256xbf16>, vector<128x256xf32> -> vector<128x256xf32>
    %6 = vector.extract_strided_slice %5 {offsets = [0, 0], sizes = [128, 128], strides = [1, 1]} : vector<128x256xf32> to vector<128x128xf32>
    %c0_4 = arith.constant 0 : index
    %c0_5 = arith.constant 0 : index
    %7 = vector.load %arg4[%c0_4, %c0_5] : memref<1x128xf32, #tpu.memory_space<vmem>>, vector<1x128xf32>
    %8 = vector.broadcast %7 : vector<1x128xf32> to vector<128x128xf32>
    %9 = arith.addf %6, %8 : vector<128x128xf32>
    %cst_6 = arith.constant 0.000000e+00 : f32
    %10 = vector.broadcast %cst_6 : f32 to vector<128x128xf32>
    %11 = arith.maximumf %9, %10 : vector<128x128xf32>
    %12 = vector.extract_strided_slice %5 {offsets = [0, 128], sizes = [128, 128], strides = [1, 1]} : vector<128x256xf32> to vector<128x128xf32>
    %c0_7 = arith.constant 0 : index
    %c0_8 = arith.constant 0 : index
    %13 = vector.load %arg7[%c0_7, %c0_8] : memref<128x128xf32, #tpu.memory_space<vmem>>, vector<128x128xf32>
    %14 = tpu.transpose %12, [1, 0] : vector<128x128xf32> -> vector<128x128xf32>
    %15 = arith.truncf %14 : vector<128x128xf32> to vector<128x128xbf16>
    %16 = arith.truncf %11 : vector<128x128xf32> to vector<128x128xbf16>
    %cst_9 = arith.constant dense<0.000000e+00> : vector<128x128xf32>
    %17 = tpu.matmul %15, %16, %cst_9 {dimension_numbers = #tpu.dot_dimension_numbers<[1], [0], [0], [1], [0, 0, 1, 1], [], []>} : vector<128x128xbf16>, vector<128x128xbf16>, vector<128x128xf32> -> vector<128x128xf32>
    %18 = arith.addf %13, %17 : vector<128x128xf32>
    %c0_10 = arith.constant 0 : index
    %c0_11 = arith.constant 0 : index
    %19 = vector.load %arg7[%c0_10, %c0_11] : memref<128x128xf32, #tpu.memory_space<vmem>>, vector<128x128xf32>
    tpu.vector_store %arg7[%c0_10, %c0_11], %18 {strides = array<i32>} : memref<128x128xf32, #tpu.memory_space<vmem>>, vector<128x128xf32>,
    %c0_i32_12 = arith.constant 0 : i32
    %20 = arith.cmpi eq, %arg1, %c0_i32_12 : i32
    %21 = arith.extui %20 : i1 to i32
    %c0_i32_13 = arith.constant 0 : i32
    %22 = arith.cmpi ne, %21, %c0_i32_13 : i32
    scf.if %22 {
      %c0_14 = arith.constant 0 : index
      %c0_15 = arith.constant 0 : index
      %23 = vector.load %arg7[%c0_14, %c0_15] : memref<128x128xf32, #tpu.memory_space<vmem>>, vector<128x128xf32>
      %c0_16 = arith.constant 0 : index
      %c0_17 = arith.constant 0 : index
      %c0_18 = arith.constant 0 : index
      %24 = vector.load %arg5[%c0_16, %c0_17, %c0_18] : memref<1x128x128xf32, #tpu.memory_space<vmem>>, vector<1x128x128xf32>
      %25 = vector.shape_cast %24 : vector<1x128x128xf32> to vector<128x128xf32>
      %26 = vector.shape_cast %23 : vector<128x128xf32> to vector<1x128x128xf32>
      tpu.vector_store %arg5[%c0_16, %c0_17, %c0_18], %26 {strides = array<i32>} : memref<1x128x128xf32, #tpu.memory_space<vmem>>, vector<1x128x128xf32>,
    } else {
    }
    return
  }
  func.func @transform_0(%arg0: i32, %arg1: i32) -> (i32, i32) {
    %c1_i32 = arith.constant 1 : i32
    %0 = arith.muli %arg0, %c1_i32 : i32
    %1 = arith.addi %0, %arg1 : i32
    %c0_i32 = arith.constant 0 : i32
    %c0_i32_0 = arith.constant 0 : i32
    return %1, %c0_i32 : i32, i32
  }
  func.func @transform_2(%arg0: i32, %arg1: i32) -> (i32, i32) {
    %c0_i32 = arith.constant 0 : i32
    %c0_i32_0 = arith.constant 0 : i32
    %c0_i32_1 = arith.constant 0 : i32
    return %c0_i32, %c0_i32_0 : i32, i32
  }
  func.func @transform_3(%arg0: i32, %arg1: i32) -> (i32, i32, i32) {
    %c0_i32 = arith.constant 0 : i32
    %c0_i32_0 = arith.constant 0 : i32
    %c0_i32_1 = arith.constant 0 : i32
    return %arg0, %c0_i32, %c0_i32_0 : i32, i32, i32
  }
}

</mosaic_0001>

<bundles_post_ra>
// kernel: tpu_custom_call.1
= control target key start
LH: loop header
LB: loop body
LE: loop exit
PB: predicated region body
PF: predicated region fallthrough
CT: control target
= control target key end

     0   :  { %8 = vsyncpa [#allocation6], 0  ;;  %s1422_s0 = inlined_call_operand.hbm [shape: bf16[256,256], index: 0, kind: input, shape index: {}]   ;;  %s1423_s1 = inlined_call_operand.hbm [shape: bf16[256,256], index: 1, kind: input, shape index: {}]   ;;  %s1424_s2 = inlined_call_operand.vmem [shape: f32[1,128], index: 2, kind: input, shape index: {}]   ;;  %s1425_s3 = inlined_call_operand.hbm [shape: f32[2,128,128], index: 3, kind: output, shape index: {}]  }
   0x1   :  { %10 = vsyncpa [#allocation6 + $0x1], 0 }
   0x2   :  { %11 = vsyncpa [#allocation7], 0 }
   0x3   :  { %13 = vsyncpa [#allocation7 + $0x1], 0  ;;  %s1186_s12 = smov 0   ;;  %s1188_s13 = smov 0  }
   0x4   :  { %s1190_s14 = smov 0   ;;  %s1192_s15 = smov 0  }
   0x5   :  { %s1194_s16 = smov 0   ;;  %s1196_s17 = smov 0  }
   0x6 LB: > { %s851_s18 = sadd.s32 4294967295, %s1150_s17   ;;  %s852_s19 = sadd.s32 4294967294, %s1150_s17   ;;  %s1150_s17 = sphi %s1196_s17, %s19_s17   ;;  %s1146_s16 = sphi %s1194_s16, %s1440_s16   ;;  %s1142_s15 = sphi %s1192_s15, %s1439_s15   ;;  %s1138_s14 = sphi %s1190_s14, %s1438_s14   ;;  %s1134_s13 = sphi %s1188_s13, %s1437_s13   ;;  %s1130_s12 = sphi %s1186_s12, %s1436_s12  }
   0x7   : > { %s31_s20 = sadd.s32 1, %s1146_s16  ;;  %s40_s21 = sadd.s32 1, %s1138_s14 }
   0x8   : > { %p33_p0 = scmp.ge.s32.totalorder %s31_s20, 2  ;;  %p47_p1 = scmp.ne.s32.totalorder %s1138_s14, %s1134_s13 }
   0x9   : > { %p48_p2 = scmp.eq.s32.totalorder %s1150_s17, 0  ;;  %p53_p3 = scmp.ne.s32.totalorder %s1134_s13, %s1130_s12 }
   0xa   : > { %s1442_s20 = smov (%p33_p0, %s31_s20), 0  ;;  %p54_p5 = scmp.eq.s32.totalorder %s851_s18, 0 }
   0xb   : > { %p1227_p4 = por %p48_p2, %p47_p1  ;;  %s37_s23 = ssub.s32 %s1146_s16, %s1442_s20 }
   0xc   : > { %p98_p6 = scmp.eq.s32.totalorder %s851_s18, 1  ;;  %p38_p7 = scmp.eq.s32.totalorder %s37_s23, 0 }
   0xd   : > { %p1233_p8 = por %p54_p5, %p53_p3  ;;  %p104_p10 = scmp.eq.s32.totalorder %s852_s19, 1 }
   0xe   : > { %p1237_p9 = por %p98_p6, %p47_p1  ;;  %p950_p13 = scmp.lt.s32.totalorder %s1150_s17, 2 }
   0xf   : > { %s1242_s26 = scalar_select %p38_p7, %s1138_s14, %s40_s21  }
  0x10   : > { %s1429_s25 = scalar_select %p1237_p9, 1, 0 }
  0x11   : > { %p1244_p11 = por %p104_p10, %p53_p3  ;;  %s127_s28 = sand.u32 1, %s1138_s14  }
  0x12   : > { %s855_s29 = sshll.u32 %s127_s28, 7  ;;  %s888_s30 = sshll.u32 %s1146_s16, 11 }
  0x13   : > { %s1430_s27 = scalar_select %p1244_p11, 1, 0 }
  0x14   : > { %s1255_s6 = scalar_lea.hbm %s1422_s0, %s888_s30  ;;  %s131_s7 = scalar_lea.vmem [#allocation5], %s855_s29 }
  0x15   : > { %s140_s8 = sshll.u32 %s131_s7, 4  ;;  %p1261_p0 = pnand %p950_p13, %p1227_p4  ;;  %s1257_s8 = int_to_ptr.vmem [resolvable:$true] %s140_s8 }
  0x16   : > { %s1266_s10 = scalar_lea.sflag [#allocation6], %s127_s28  ;;  %s1036_s11 = scalar_lea.hbm %s1255_s6, 2048 }
  0x17   : > { %p1037_p2 = scmp.ne.s32.totalorder %s1255_s6, %s1036_s11  ;;  %p1038_p3 = pneg %p1261_p0 }
  0x18   : > { %s1041_s21 = scalar_lea.hbm %s1422_s0, 4096  ;;  %p1042_p4 = scmp.lt.u32.totalorder %s1255_s6, %s1422_s0 }
  0x19   : > { %p1039_p5 = pnand %p1038_p3, %p1037_p2  ;;  %p1043_p7 = scmp.lt.u32.totalorder %s1041_s21, %s1036_s11 }
  0x1a   : > { %p1045_p13 = scmp.lt.u32.totalorder %s1036_s11, %s1255_s6 }
  0x1b   : > { %p1040_p6 = pneg %p1039_p5  ;;  %p1044_p10 = por %p1043_p7, %p1042_p4 }
  0x1d   : > { %p1046_p12 = por %p1045_p13, %p1044_p10 }
  0x1f   : > { %p1047_p1 = pnand %p1046_p12, %p1040_p6 }
  0x21   : > { %1050 = shalt.err (!%p1047_p1)
}
  0x22   : > { %s1051_s28 = scalar_lea.vmem %s1257_s8, 2048  ;;  %s1152_s29 = smov [#allocation5]  }
  0x23   : > { %p1052_p2 = scmp.ne.s32.totalorder %s1257_s8, %s1051_s28  ;;  %s1056_s30 = sshll.u32 %s1152_s29, 4  ;;  %s1057_s30 = int_to_ptr.vmem [resolvable:$false] %s1056_s30 }
  0x24   : > { %s1058_s4 = scalar_lea.vmem %s1057_s30, 4096  ;;  %p1059_p9 = scmp.lt.s32.totalorder %s1257_s8, %s1057_s30 }
  0x25   : > { %p1054_p5 = pnand %p1052_p2, %p1038_p3  ;;  %p1060_p4 = scmp.lt.s32.totalorder %s1058_s4, %s1051_s28 }
  0x27   : > { %p1055_p11 = pneg %p1054_p5  ;;  %p1061_p7 = por %p1060_p4, %p1059_p9 }
  0x29   : > { %p1062_p10 = pnand %p1061_p7, %p1055_p11 }
  0x2b   : > { %1065 = shalt.err (!%p1062_p10)
}
  0x2c   : > { %s1153_s5 = smov 128   ;;  %s1154_s7 = smov 8  }
  0x2d   : > { %945 = dma.hbm_to_vmem [thread:$0]  (!%p1261_p0), %s1255_s6, 2048, %s1257_s8, %s1266_s10, %s1153_s5, %s1153_s5, %s1154_s7  }
  0x2e   : > { %p148_p12 = scmp.lt.s32.totalorder %s1150_s17, 3  ;;  %p1432_p1 = scmp.ge.s32.totalorder %s1150_s17, 1 }
  0x30   : > { %p149_p3 = pnand %p1432_p1, %p148_p12 }
  0x31   : > { %s1298_s11 = sand.u32 (!%p149_p3), 1, %s1134_s13  }
  0x32   : > { %152 = sbr.rel (%p149_p3) target bundleno = 771 (0x303), region = 28  ;;  %s860_s18 = sshll.u32 (!%p149_p3), %s1298_s11, 7 }
  0x33   : > { %s155_s19 = scalar_lea.sflag (!%p149_p3), [#allocation6], %s1298_s11  ;;  %s1302_s21 = scalar_lea.vmem (!%p149_p3), [#allocation5], %s860_s18 }
  0x39   : > { %1119 = dma.done.wait (%p1233_p8), %s155_s19, 2048  }
  0x3a   : > { %1121 = vsyncadd (%p1233_p8), %s155_s19, 4294965248  ;;  %s1308_s6 = scalar_lea.vmem [#allocation8], %s860_s18 }
  0x3b   : > { %s190_s8 = sld [smem:[#allocation0]]   ;;  %s1155_s9 = smov [#allocation2]  }
  0x3c   : > { %s198_s10 = sshll.u32 %s1155_s9, 4  ;;  %s1156_s22 = smov 256   ;;  %s199_s10 = int_to_ptr.vmem [resolvable:$true] %s198_s10 }
  0x3d   : > { %202 = sst [smem:[#allocation10]] %s1156_s22  ;;  %s1157_s23 = smov 2  }
  0x3e   : > { %204 = sst [smem:[#allocation10 + $0x1]] %s1156_s22  ;;  %s1158_s28 = smov 64  }
  0x3f   : > { %206 = sst [smem:[#allocation10 + $0x2]] %s1157_s23  ;;  %s1159_s30 = smov 128  }
  0x40   : > { %208 = sst [smem:[#allocation10 + $0x3]] %s1158_s28  ;;  %s1160_s24 = smov 4  }
  0x41   : > { %s862_s29 = sshll.u32 %s190_s8, 26  ;;  %210 = sst [smem:[#allocation10 + $0x4]] %s1159_s30 }
  0x42   : > { %s863_s4 = sadd.s32 134217728, %s862_s29  ;;  %212 = sst [smem:[#allocation10 + $0x5]] %s1157_s23 }
  0x43   : > { %214 = sst [smem:[#allocation10 + $0x6]] %s1159_s30  ;;  %s1161_s5 = smov [#allocation4]  }
  0x44   : > { %216 = sst [smem:[#allocation10 + $0x7]] %s1158_s28  ;;  %s1162_s7 = smov [#allocation9]  }
  0x45   : > { %218 = sst [smem:[#allocation10 + $0x8]] %s1160_s24 }
  0x46   : > { %220 = dma.general %s1423_s1, 4096, %s199_s10, %s1161_s5, %s1162_s7, [#allocation10], %s863_s4, 0  }
  0x47   : > { %1122 = dma.done.wait [#allocation4], 4096 }
  0x48   : > { %1123 = vsyncadd [#allocation4], 4294963200  ;;  %v258_v0 = vld [vmem:[#allocation2 + $0x8] sm:$0xff]  ;;  %v257_v1 = vld [vmem:[#allocation2] sm:$0xff]  ;;  %s763_s10 = sshll.u32 %s1308_s6, 4  ;;  %p1433_p9 = scmp.ne.s32.totalorder %s1429_s25, 0  ;;  %s1370_s10 = int_to_ptr.vmem [resolvable:$true] %s763_s10 }
  0x49   : > { %v260_v2 = vld [vmem:[#allocation2 + $0x18] sm:$0xff]  ;;  %369 = vmatprep.subr.bf16.mxu0 %v258_v0  ;;  %v259_v3 = vld [vmem:[#allocation2 + $0x10] sm:$0xff]  ;;  %v262_v4 = vld [vmem:[#allocation2 + $0x28] sm:$0xff]  ;;  %s1066_s29 = scalar_lea.vmem %s1370_s10, 2048  ;;  %s1163_s30 = smov [#allocation8]  }
  0x4a   : > { %370 = vmatpush1.bf16.msra.mxu0 %v257_v1  ;;  %v261_v5 = vld [vmem:[#allocation2 + $0x20] sm:$0xff]  ;;  %v264_v6 = vld [vmem:[#allocation2 + $0x38] sm:$0xff]  ;;  %v263_v7 = vld [vmem:[#allocation2 + $0x30] sm:$0xff]  ;;  %p1067_p8 = scmp.ne.s32.totalorder %s1370_s10, %s1066_s29  ;;  %s1070_s4 = sshll.u32 %s1163_s30, 4  ;;  %s1071_s4 = int_to_ptr.vmem [resolvable:$false] %s1070_s4 }
  0x4b   : > { %371 = vmatprep.subr.bf16.mxu0 %v260_v2  ;;  %v1014_v8 = vld [vmem:[%s1302_s21 + $0x4] ss:$8 sps:$4 sm:$0xff]   ;;  %v268_v11 = vld [vmem:[#allocation2 + $0x58] sm:$0xff]  ;;  %v267_v12 = vld [vmem:[#allocation2 + $0x50] sm:$0xff]  ;;  %s1072_s24 = scalar_lea.vmem %s1071_s4, 4096  ;;  %p1073_p6 = scmp.lt.s32.totalorder %s1370_s10, %s1071_s4 }
  0x4c   : > { %v266_v9 = vld [vmem:[#allocation2 + $0x48] sm:$0xff]  ;;  %401 = vmatprep.mubr.bf16.mxu0 %v1014_v8  ;;  %v265_v10 = vld [vmem:[#allocation2 + $0x40] sm:$0xff]  ;;  %v272_v15 = vld [vmem:[#allocation2 + $0x78] sm:$0xff]  ;;  %p1068_p11 = pnand %p1067_p8, %p1433_p9  ;;  %p1074_p13 = scmp.lt.s32.totalorder %s1072_s24, %s1066_s29 }
  0x4d   : > { %v270_v13 = vld [vmem:[#allocation2 + $0x68] sm:$0xff]  ;;  %v269_v14 = vld [vmem:[#allocation2 + $0x60] sm:$0xff]  ;;  %v271_v16 = vld [vmem:[#allocation2 + $0x70] sm:$0xff] }
  0x4e   : > { %372 = vmatpush1.bf16.msra.mxu0 %v259_v3  ;;  %v274_v17 = vld [vmem:[#allocation2 + $0x88] sm:$0xff]  ;;  %v273_v18 = vld [vmem:[#allocation2 + $0x80] sm:$0xff]  ;;  %v276_v19 = vld [vmem:[#allocation2 + $0x98] sm:$0xff]  ;;  %p1069_p0 = pneg %p1068_p11  ;;  %p1075_p2 = por %p1074_p13, %p1073_p6 }
  0x4f   : > { %373 = vmatprep.subr.bf16.mxu0 %v262_v4  ;;  %v275_v20 = vld [vmem:[#allocation2 + $0x90] sm:$0xff]  ;;  %v278_v21 = vld [vmem:[#allocation2 + $0xa8] sm:$0xff]  ;;  %v277_v22 = vld [vmem:[#allocation2 + $0xa0] sm:$0xff] }
  0x50   : > { %v280_v23 = vld [vmem:[#allocation2 + $0xb8] sm:$0xff]  ;;  %v279_v24 = vld [vmem:[#allocation2 + $0xb0] sm:$0xff]  ;;  %v282_v25 = vld [vmem:[#allocation2 + $0xc8] sm:$0xff]  ;;  %p1076_p5 = pnand %p1075_p2, %p1069_p0 }
  0x51   : > { %v281_v26 = vld [vmem:[#allocation2 + $0xc0] sm:$0xff]  ;;  %v284_v27 = vld [vmem:[#allocation2 + $0xd8] sm:$0xff]  ;;  %v283_v28 = vld [vmem:[#allocation2 + $0xd0] sm:$0xff] }
  0x52   : > { %374 = vmatpush1.bf16.msra.mxu0 %v261_v5  ;;  %v286_v29 = vld [vmem:[#allocation2 + $0xe8] sm:$0xff]  ;;  %v285_v30 = vld [vmem:[#allocation2 + $0xe0] sm:$0xff]  ;;  %v288_v31 = vld [vmem:[#allocation2 + $0xf8] sm:$0xff] }
  0x53   : > { %375 = vmatprep.subr.bf16.mxu0 %v264_v6  ;;  %v287_v32 = vld [vmem:[#allocation2 + $0xf0] sm:$0xff]  ;;  %v1012_v33 = vld [vmem:[%s1302_s21] ss:$8 sps:$4 sm:$0xff]   ;;  %v1018_v36 = vld [vmem:[%s1302_s21 + $0x24] ss:$8 sps:$4 sm:$0xff]  }
  0x54   : > { %v1015_v34 = vld [vmem:[%s1302_s21 + $0x14] ss:$8 sps:$4 sm:$0xff]   ;;  %v1017_v35 = vld [vmem:[%s1302_s21 + $0x10] ss:$8 sps:$4 sm:$0xff]   ;;  %v1020_v37 = vld [vmem:[%s1302_s21 + $0x20] ss:$8 sps:$4 sm:$0xff]  }
  0x55   : > { %v1021_v38 = vld [vmem:[%s1302_s21 + $0x34] ss:$8 sps:$4 sm:$0xff]   ;;  %v1023_v39 = vld [vmem:[%s1302_s21 + $0x30] ss:$8 sps:$4 sm:$0xff]   ;;  %v1024_v40 = vld [vmem:[%s1302_s21 + $0x44] ss:$8 sps:$4 sm:$0xff]  }
  0x56   : > { %376 = vmatpush1.bf16.msra.mxu0 %v263_v7  ;;  %v1026_v41 = vld [vmem:[%s1302_s21 + $0x40] ss:$8 sps:$4 sm:$0xff]   ;;  %v1027_v42 = vld [vmem:[%s1302_s21 + $0x54] ss:$8 sps:$4 sm:$0xff]   ;;  %v1029_v43 = vld [vmem:[%s1302_s21 + $0x50] ss:$8 sps:$4 sm:$0xff]  }
  0x57   : > { %377 = vmatprep.subr.bf16.mxu0 %v266_v9  ;;  %v1030_v44 = vld [vmem:[%s1302_s21 + $0x64] ss:$8 sps:$4 sm:$0xff]   ;;  %v1032_v45 = vld [vmem:[%s1302_s21 + $0x60] ss:$8 sps:$4 sm:$0xff]   ;;  %v1033_v46 = vld [vmem:[%s1302_s21 + $0x74] ss:$8 sps:$4 sm:$0xff]  }
  0x58   : > { %v1035_v47 = vld [vmem:[%s1302_s21 + $0x70] ss:$8 sps:$4 sm:$0xff]   ;;  %v1332_v48 = vld [vmem:[%s1424_s2] ss:$0 sm:$0xff]  ;;  %s889_s21 = sshll.u32 %s1142_s15, 11  ;;  %s750_s15 = scalar_lea.sflag [#allocation7], %s1298_s11 }
  0x59   : > { %s1368_s28 = scalar_lea.hbm %s1425_s3, %s889_s21 }
  0x5a   : > { %378 = vmatpush1.bf16.msra.mxu0 %v265_v10 }
  0x5b   : > { %379 = vmatprep.subr.bf16.mxu0 %v268_v11 }
  0x5e   : > { %380 = vmatpush1.bf16.msra.mxu0 %v267_v12 }
  0x5f   : > { %381 = vmatprep.subr.bf16.mxu0 %v270_v13 }
  0x62   : > { %382 = vmatpush1.bf16.msra.mxu0 %v269_v14 }
  0x63   : > { %383 = vmatprep.subr.bf16.mxu0 %v272_v15 }
  0x66   : > { %384 = vmatpush1.bf16.msra.mxu0 %v271_v16 }
  0x67   : > { %385 = vmatprep.subr.bf16.mxu0 %v274_v17 }
  0x6a   : > { %386 = vmatpush1.bf16.msra.mxu0 %v273_v18 }
  0x6b   : > { %387 = vmatprep.subr.bf16.mxu0 %v276_v19 }
  0x6e   : > { %388 = vmatpush1.bf16.msra.mxu0 %v275_v20 }
  0x6f   : > { %389 = vmatprep.subr.bf16.mxu0 %v278_v21 }
  0x72   : > { %390 = vmatpush1.bf16.msra.mxu0 %v277_v22 }
  0x73   : > { %391 = vmatprep.subr.bf16.mxu0 %v280_v23 }
  0x76   : > { %392 = vmatpush1.bf16.msra.mxu0 %v279_v24 }
  0x77   : > { %393 = vmatprep.subr.bf16.mxu0 %v282_v25 }
  0x7a   : > { %394 = vmatpush1.bf16.msra.mxu0 %v281_v26 }
  0x7b   : > { %395 = vmatprep.subr.bf16.mxu0 %v284_v27 }
  0x7e   : > { %396 = vmatpush1.bf16.msra.mxu0 %v283_v28 }
  0x7f   : > { %397 = vmatprep.subr.bf16.mxu0 %v286_v29 }
  0x82   : > { %398 = vmatpush1.bf16.msra.mxu0 %v285_v30 }
  0x83   : > { %399 = vmatprep.subr.bf16.mxu0 %v288_v31 }
  0x86   : > { %400 = vmatpush1.bf16.msra.mxu0 %v287_v32 }
  0x89   : > { %402 = vmatmul.mubr.bf16.vlgmr.msra.gmra.mrb[0].mxu0 %v1012_v33 }
  0x8a   : > { %411 = vmatprep.mubr.bf16.mxu0 %v1015_v34 }
  0x91   : > { %412 = vmatmul.mubr.bf16.gmra.mrb[4].mxu0 %v1017_v35 }
  0x92   : > { %421 = vmatprep.mubr.bf16.mxu0 %v1018_v36 }
  0x99   : > { %422 = vmatmul.mubr.bf16.gmra.mrb[8].mxu0 %v1020_v37 }
  0x9a   : > { %431 = vmatprep.mubr.bf16.mxu0 %v1021_v38 }
  0xa1   : > { %432 = vmatmul.mubr.bf16.gmra.mrb[12].mxu0 %v1023_v39 }
  0xa2   : > { %441 = vmatprep.mubr.bf16.mxu0 %v1024_v40 }
  0xa9   : > { %442 = vmatmul.mubr.bf16.gmra.mrb[16].mxu0 %v1026_v41 }
  0xaa   : > { %451 = vmatprep.mubr.bf16.mxu0 %v1027_v42 }
  0xb1   : > { %452 = vmatmul.mubr.bf16.gmra.mrb[20].mxu0 %v1029_v43 }
  0xb2   : > { %461 = vmatprep.mubr.bf16.mxu0 %v1030_v44 }
  0xb9   : > { %462 = vmatmul.mubr.bf16.gmra.mrb[24].mxu0 %v1032_v45 }
  0xba   : > { %471 = vmatprep.mubr.bf16.mxu0 %v1033_v46 }
  0xc1   : > { %472 = vmatmul.mubr.bf16.gmra.mrb[28].mxu0 %v1035_v47 }
 0x15c   : > { %v403_v49 = vpop.f32.mrb[0].mxu0 }
 0x15d   : > { %v489_v50 = vadd.f32 %v1332_v48, %v403_v49  ;;  %v405_v51 = vpop.f32.mrb[1].mxu0 }
 0x15e   : > { %v407_v52 = vpop.f32.mrb[2].mxu0  ;;  %537 = vxpose.xlu0.b32.start [1/16] %v405_v51, 128 }
 0x15f   : > { %v490_v53 = vadd.f32 %v1332_v48, %v407_v52  ;;  %v409_v54 = vpop.f32.mrb[3].mxu0  ;;  %v505_v55 = vmax.f32 %v489_v50, 0.0 }
 0x161   : > { %v506_v56 = vmax.f32 %v490_v53, 0.0 }
 0x162   : > { %538 = vxpose.xlu0.b32.cont [2/16] %v409_v54, 128 }
 0x163   : > { %v577_v57 = vpack.c.bf16 %v506_v56, %v505_v55 }
 0x164   : > { %v413_v58 = vpop.f32.mrb[4].mxu0 }
 0x165   : > { %v491_v59 = vadd.f32 %v1332_v48, %v413_v58  ;;  %v415_v60 = vpop.f32.mrb[5].mxu0  ;;  %906 = vmatprep.subr.bf16.mxu1 %v577_v57 }
 0x166   : > { %v417_v61 = vpop.f32.mrb[6].mxu0  ;;  %539 = vxpose.xlu0.b32.cont [3/16] %v415_v60, 128  ;;  %907 = vmatpush3.bf16.msra.mxu1 %v577_v57 }
 0x167   : > { %v492_v62 = vadd.f32 %v1332_v48, %v417_v61  ;;  %v419_v63 = vpop.f32.mrb[7].mxu0  ;;  %v507_v0 = vmax.f32 %v491_v59, 0.0 }
 0x169   : > { %v508_v1 = vmax.f32 %v492_v62, 0.0 }
 0x16a   : > { %540 = vxpose.xlu0.b32.cont [4/16] %v419_v63, 128 }
 0x16b   : > { %v578_v2 = vpack.c.bf16 %v508_v1, %v507_v0 }
 0x16c   : > { %v423_v3 = vpop.f32.mrb[8].mxu0 }
 0x16d   : > { %v493_v4 = vadd.f32 %v1332_v48, %v423_v3  ;;  %v425_v5 = vpop.f32.mrb[9].mxu0  ;;  %908 = vmatprep.subr.bf16.mxu1 %v578_v2 }
 0x16e   : > { %v427_v6 = vpop.f32.mrb[10].mxu0  ;;  %541 = vxpose.xlu0.b32.cont [5/16] %v425_v5, 128  ;;  %909 = vmatpush3.bf16.msra.mxu1 %v578_v2 }
 0x16f   : > { %v494_v7 = vadd.f32 %v1332_v48, %v427_v6  ;;  %v429_v8 = vpop.f32.mrb[11].mxu0  ;;  %v509_v9 = vmax.f32 %v493_v4, 0.0 }
 0x171   : > { %v510_v10 = vmax.f32 %v494_v7, 0.0 }
 0x172   : > { %542 = vxpose.xlu0.b32.cont [6/16] %v429_v8, 128 }
 0x173   : > { %v579_v11 = vpack.c.bf16 %v510_v10, %v509_v9 }
 0x174   : > { %v433_v12 = vpop.f32.mrb[12].mxu0 }
 0x175   : > { %v495_v13 = vadd.f32 %v1332_v48, %v433_v12  ;;  %v435_v14 = vpop.f32.mrb[13].mxu0  ;;  %910 = vmatprep.subr.bf16.mxu1 %v579_v11 }
 0x176   : > { %v437_v15 = vpop.f32.mrb[14].mxu0  ;;  %543 = vxpose.xlu0.b32.cont [7/16] %v435_v14, 128  ;;  %911 = vmatpush3.bf16.msra.mxu1 %v579_v11 }
 0x177   : > { %v496_v16 = vadd.f32 %v1332_v48, %v437_v15  ;;  %v439_v17 = vpop.f32.mrb[15].mxu0  ;;  %v511_v18 = vmax.f32 %v495_v13, 0.0 }
 0x179   : > { %v512_v19 = vmax.f32 %v496_v16, 0.0 }
 0x17a   : > { %544 = vxpose.xlu0.b32.cont [8/16] %v439_v17, 128 }
 0x17b   : > { %v580_v20 = vpack.c.bf16 %v512_v19, %v511_v18 }
 0x17c   : > { %v443_v21 = vpop.f32.mrb[16].mxu0 }
 0x17d   : > { %v497_v22 = vadd.f32 %v1332_v48, %v443_v21  ;;  %v445_v23 = vpop.f32.mrb[17].mxu0  ;;  %912 = vmatprep.subr.bf16.mxu1 %v580_v20 }
 0x17e   : > { %v447_v24 = vpop.f32.mrb[18].mxu0  ;;  %545 = vxpose.xlu0.b32.cont [9/16] %v445_v23, 128  ;;  %913 = vmatpush3.bf16.msra.mxu1 %v580_v20 }
 0x17f   : > { %v498_v25 = vadd.f32 %v1332_v48, %v447_v24  ;;  %v449_v26 = vpop.f32.mrb[19].mxu0  ;;  %v513_v27 = vmax.f32 %v497_v22, 0.0 }
 0x181   : > { %v514_v28 = vmax.f32 %v498_v25, 0.0 }
 0x182   : > { %546 = vxpose.xlu0.b32.cont [10/16] %v449_v26, 128 }
 0x183   : > { %v581_v29 = vpack.c.bf16 %v514_v28, %v513_v27 }
 0x184   : > { %v453_v30 = vpop.f32.mrb[20].mxu0 }
 0x185   : > { %v499_v31 = vadd.f32 %v1332_v48, %v453_v30  ;;  %v455_v32 = vpop.f32.mrb[21].mxu0  ;;  %914 = vmatprep.subr.bf16.mxu1 %v581_v29 }
 0x186   : > { %v457_v33 = vpop.f32.mrb[22].mxu0  ;;  %547 = vxpose.xlu0.b32.cont [11/16] %v455_v32, 128  ;;  %915 = vmatpush3.bf16.msra.mxu1 %v581_v29 }
 0x187   : > { %v500_v34 = vadd.f32 %v1332_v48, %v457_v33  ;;  %v459_v35 = vpop.f32.mrb[23].mxu0  ;;  %v515_v36 = vmax.f32 %v499_v31, 0.0 }
 0x189   : > { %v516_v37 = vmax.f32 %v500_v34, 0.0 }
 0x18a   : > { %548 = vxpose.xlu0.b32.cont [12/16] %v459_v35, 128 }
 0x18b   : > { %v582_v38 = vpack.c.bf16 %v516_v37, %v515_v36 }
 0x18c   : > { %v463_v39 = vpop.f32.mrb[24].mxu0 }
 0x18d   : > { %v501_v40 = vadd.f32 %v1332_v48, %v463_v39  ;;  %v465_v41 = vpop.f32.mrb[25].mxu0  ;;  %916 = vmatprep.subr.bf16.mxu1 %v582_v38 }
 0x18e   : > { %v467_v42 = vpop.f32.mrb[26].mxu0  ;;  %549 = vxpose.xlu0.b32.cont [13/16] %v465_v41, 128  ;;  %917 = vmatpush3.bf16.msra.mxu1 %v582_v38 }
 0x18f   : > { %v502_v43 = vadd.f32 %v1332_v48, %v467_v42  ;;  %v469_v44 = vpop.f32.mrb[27].mxu0  ;;  %v517_v45 = vmax.f32 %v501_v40, 0.0 }
 0x191   : > { %v518_v46 = vmax.f32 %v502_v43, 0.0 }
 0x192   : > { %550 = vxpose.xlu0.b32.cont [14/16] %v469_v44, 128 }
 0x193   : > { %v583_v47 = vpack.c.bf16 %v518_v46, %v517_v45 }
 0x194   : > { %v473_v49 = vpop.f32.mrb[28].mxu0 }
 0x195   : > { %v503_v50 = vadd.f32 %v1332_v48, %v473_v49  ;;  %v475_v51 = vpop.f32.mrb[29].mxu0  ;;  %918 = vmatprep.subr.bf16.mxu1 %v583_v47 }
 0x196   : > { %v477_v52 = vpop.f32.mrb[30].mxu0  ;;  %551 = vxpose.xlu0.b32.cont [15/16] %v475_v51, 128  ;;  %919 = vmatpush3.bf16.msra.mxu1 %v583_v47 }
 0x197   : > { %v504_v53 = vadd.f32 %v1332_v48, %v477_v52  ;;  %v479_v54 = vpop.f32.mrb[31].mxu0  ;;  %v519_v55 = vmax.f32 %v503_v50, 0.0 }
 0x199   : > { %v520_v56 = vmax.f32 %v504_v53, 0.0 }
 0x19a   : > { %552 = vxpose.xlu0.b32.end [16/16] %v479_v54, 128 }
 0x19b   : > { %v584_v57 = vpack.c.bf16 %v520_v56, %v519_v55 }
 0x19d   : > { %920 = vmatprep.subr.bf16.mxu1 %v584_v57 }
 0x19e   : > { %921 = vmatpush3.bf16.msra.mxu1 %v584_v57 }
 0x1de   : > { %v553_v58 = vpop.trf.xlu0 }
 0x1e2   : > { %v554_v59 = vpop.trf.xlu0 }
 0x1e3   : > { %v569_v60 = vpack.c.bf16 %v554_v59, %v553_v58 }
 0x1e5   : > { %922 = vmatprep.mubr.bf16.mxu1 %v569_v60 }
 0x1e6   : > { %v555_v61 = vpop.trf.xlu0 }
 0x1ea   : > { %v556_v62 = vpop.trf.xlu0 }
 0x1eb   : > { %v570_v63 = vpack.c.bf16 %v556_v62, %v555_v61 }
 0x1ed   : > { %923 = vmatmul.mubr.bf16.vlgmr.msra.gmra.mrb[0].mxu1 %v570_v63 }
 0x1ee   : > { %v557_v0 = vpop.trf.xlu0 }
 0x1f2   : > { %v558_v1 = vpop.trf.xlu0 }
 0x1f3   : > { %v571_v2 = vpack.c.bf16 %v558_v1, %v557_v0 }
 0x1f5   : > { %926 = vmatprep.mubr.bf16.mxu1 %v571_v2 }
 0x1f6   : > { %v559_v48 = vpop.trf.xlu0 }
 0x1fa   : > { %v560_v3 = vpop.trf.xlu0 }
 0x1fb   : > { %v572_v4 = vpack.c.bf16 %v560_v3, %v559_v48 }
 0x1fd   : > { %927 = vmatmul.mubr.bf16.gmra.mrb[4].mxu1 %v572_v4 }
 0x1fe   : > { %v561_v5 = vpop.trf.xlu0 }
 0x202   : > { %v562_v6 = vpop.trf.xlu0 }
 0x203   : > { %v573_v7 = vpack.c.bf16 %v562_v6, %v561_v5 }
 0x205   : > { %930 = vmatprep.mubr.bf16.mxu1 %v573_v7 }
 0x206   : > { %v563_v8 = vpop.trf.xlu0 }
 0x20a   : > { %v564_v9 = vpop.trf.xlu0 }
 0x20b   : > { %v574_v10 = vpack.c.bf16 %v564_v9, %v563_v8 }
 0x20d   : > { %931 = vmatmul.mubr.bf16.gmra.mrb[8].mxu1 %v574_v10 }
 0x20e   : > { %v565_v11 = vpop.trf.xlu0 }
 0x212   : > { %v566_v12 = vpop.trf.xlu0 }
 0x213   : > { %v575_v13 = vpack.c.bf16 %v566_v12, %v565_v11 }
 0x215   : > { %934 = vmatprep.mubr.bf16.mxu1 %v575_v13 }
 0x216   : > { %v567_v14 = vpop.trf.xlu0 }
 0x21a   : > { %v568_v15 = vpop.trf.xlu0 }
 0x21b   : > { %v576_v16 = vpack.c.bf16 %v568_v15, %v567_v14 }
 0x21d   : > { %935 = vmatmul.mubr.bf16.gmra.mrb[12].mxu1 %v576_v16 }
 0x2c0   : > { %v924_v17 = vpop.f32.mrb[0].mxu1 }
 0x2c1   : > { %735 = vst [vmem:[%s1308_s6 + $0x10] sm:$0xff] %v924_v17  ;;  %v619_v18 = vpop.f32.mrb[1].mxu1 }
 0x2c2   : > { %733 = vst [vmem:[%s1308_s6] sm:$0xff] %v619_v18  ;;  %v925_v19 = vpop.f32.mrb[2].mxu1 }
 0x2c3   : > { %736 = vst [vmem:[%s1308_s6 + $0x18] sm:$0xff] %v925_v19  ;;  %v622_v20 = vpop.f32.mrb[3].mxu1 }
 0x2c4   : > { %734 = vst [vmem:[%s1308_s6 + $0x8] sm:$0xff] %v622_v20 }
 0x2d0   : > { %v928_v21 = vpop.f32.mrb[4].mxu1 }
 0x2d1   : > { %739 = vst [vmem:[%s1308_s6 + $0x30] sm:$0xff] %v928_v21  ;;  %v635_v22 = vpop.f32.mrb[5].mxu1 }
 0x2d2   : > { %737 = vst [vmem:[%s1308_s6 + $0x20] sm:$0xff] %v635_v22  ;;  %v929_v23 = vpop.f32.mrb[6].mxu1 }
 0x2d3   : > { %740 = vst [vmem:[%s1308_s6 + $0x38] sm:$0xff] %v929_v23  ;;  %v638_v24 = vpop.f32.mrb[7].mxu1 }
 0x2d4   : > { %738 = vst [vmem:[%s1308_s6 + $0x28] sm:$0xff] %v638_v24 }
 0x2e0   : > { %v932_v25 = vpop.f32.mrb[8].mxu1 }
 0x2e1   : > { %743 = vst [vmem:[%s1308_s6 + $0x50] sm:$0xff] %v932_v25  ;;  %v651_v26 = vpop.f32.mrb[9].mxu1 }
 0x2e2   : > { %741 = vst [vmem:[%s1308_s6 + $0x40] sm:$0xff] %v651_v26  ;;  %v933_v27 = vpop.f32.mrb[10].mxu1 }
 0x2e3   : > { %744 = vst [vmem:[%s1308_s6 + $0x58] sm:$0xff] %v933_v27  ;;  %v654_v28 = vpop.f32.mrb[11].mxu1 }
 0x2e4   : > { %742 = vst [vmem:[%s1308_s6 + $0x48] sm:$0xff] %v654_v28 }
 0x2f0   : > { %v936_v29 = vpop.f32.mrb[12].mxu1 }
 0x2f1   : > { %747 = vst [vmem:[%s1308_s6 + $0x70] sm:$0xff] %v936_v29  ;;  %v667_v30 = vpop.f32.mrb[13].mxu1 }
 0x2f2   : > { %745 = vst [vmem:[%s1308_s6 + $0x60] sm:$0xff] %v667_v30  ;;  %v937_v31 = vpop.f32.mrb[14].mxu1 }
 0x2f3   : > { %748 = vst [vmem:[%s1308_s6 + $0x78] sm:$0xff] %v937_v31  ;;  %v670_v32 = vpop.f32.mrb[15].mxu1 }
 0x2f4   : > { %746 = vst [vmem:[%s1308_s6 + $0x68] sm:$0xff] %v670_v32 }
 0x2f5   : > { %1079 = shalt.err (!%p1076_p5)
}
 0x2f6   : > { %s1080_s6 = scalar_lea.hbm %s1368_s28, 2048  ;;  %s1084_s18 = scalar_lea.hbm %s1425_s3, 4096 }
 0x2f7   : > { %p1081_p4 = scmp.ne.s32.totalorder %s1368_s28, %s1080_s6  ;;  %p1085_p12 = scmp.lt.u32.totalorder %s1368_s28, %s1425_s3 }
 0x2f8   : > { %p1086_p1 = scmp.lt.u32.totalorder %s1084_s18, %s1080_s6  ;;  %p1088_p8 = scmp.lt.u32.totalorder %s1080_s6, %s1368_s28 }
 0x2f9   : > { %p1082_p7 = pnand %p1081_p4, %p1433_p9 }
 0x2fa   : > { %p1087_p3 = por %p1086_p1, %p1085_p12 }
 0x2fb   : > { %p1083_p10 = pneg %p1082_p7 }
 0x2fc   : > { %p1089_p11 = por %p1088_p8, %p1087_p3 }
 0x2fe   : > { %p1090_p0 = pnand %p1089_p11, %p1083_p10 }
 0x300   : > { %1093 = shalt.err (!%p1090_p0)
}
 0x301   : > { %s1164_s9 = smov 128   ;;  %s1165_s21 = smov 8  }
 0x302   : > { %940 = dma.vmem_to_hbm [thread:$0]  (%p1433_p9), %s1370_s10, 2048, %s1368_s28, %s750_s15, %s1164_s9, %s1164_s9, %s1165_s21  }
 0x303 PF: > { %s778_s22 = sand.u32 1, %s1130_s12   ;;  %p1434_p6 = scmp.ne.s32.totalorder %s1430_s27, 0 }
 0x304   : > { %p1435_p13 = scmp.ge.s32.totalorder %s1150_s17, 2  ;;  %s779_s23 = scalar_lea.sflag [#allocation7], %s778_s22 }
 0x306   : > { %p947_p2 = pnand %p1435_p13, %p1434_p6 }
 0x308   : > { %1125 = dma.done.wait (!%p947_p2), %s779_s23, 2048  }
 0x309   : > { %1127 = vsyncadd (!%p947_p2), %s779_s23, 4294965248  ;;  %s19_s17 = sadd.s32 1, %s1150_s17   ;;  %s1436_s12 = smov %s1134_s13 }
 0x30a   : > { %p16_p5 = scmp.ge.s32.totalorder %s19_s17, 4   ;;  %s1437_s13 = smov %s1138_s14 }
 0x30b   : > { %s1438_s14 = smov %s1242_s26  ;;  %s1439_s15 = smov %s1146_s16 }
 0x30c   : > { %s1440_s16 = smov %s1442_s20  ;;  %18 = sbr.rel (!%p16_p5) target bundleno = 6 (0x6), region = 89 }
 0x313   :  { %784 = vsyncpa [#allocation6], 1 }
 0x314   :  { %786 = vsyncpa [#allocation6 + $0x1], 1 }
 0x315   :  { %787 = vsyncpa [#allocation7], 1 }
 0x316   :  { %789 = vsyncpa [#allocation7 + $0x1], 1 }
 0x317   :  { %790 = vsyncmov [#allocation4] }
 0x31a   :  { %s791_s25 = vpop.sfrf %790 }
 0x31b   :  { %p886_p9 = scmp.ne.s32.totalorder %s791_s25, 0 }
 0x31d   :  { %795 = shalt.err (%p886_p9)  }

</bundles_post_ra>
